<compile_context>
chip_gen: v5e
topology: v5e:2x2
jax: 0.10.0
libtpu: 0.0.40
codegen_flags: <defaults>
</compile_context>

<pallas_src>
import functools

import numpy as np

import jax
import jax.numpy as jnp
from jax.experimental import pallas as pl
from jax.experimental.pallas import tpu as pltpu

_NEG_BIG = -1e30  # finite "minus infinity" (avoids inf-inf -> nan in online softmax)


def _message_aggregator_kernel(ts_ref, tc_ref,   # SMEM (nt,) int32: per-node-tile instance-tile start / count
                               nodes_ref,        # VMEM (TN, 1)    int32  node ids (row tile)
                               names_ref,        # VMEM (1, TM)    int32  instance `name` column tile (sorted)
                               a1_ref,           # VMEM (TN, H)    f32    features @ W1.T
                               a2_ref,           # VMEM (H, TM)    f32    emb @ attn2.T (sorted)
                               emb_ref,          # VMEM (TM, D+1)  bf16   [emb | 1] tile (sorted)
                               out_ref,          # VMEM (TN, H*D)  f32
                               m_ref,            # scratch (TN, H)      f32  running max per head
                               acc_ref,          # scratch (H, TN, D+1) f32  running [sum p*emb | sum p]
                               *, alpha, num_heads, hidden_size):
    ni = pl.program_id(0)
    j = pl.program_id(1)
    H = num_heads
    D = hidden_size

    @pl.when(j == 0)
    def _init():
        m_ref[...] = jnp.full_like(m_ref, _NEG_BIG)
        acc_ref[...] = jnp.zeros_like(acc_ref)

    @pl.when(j < tc_ref[ni])                      # skip padded sweep steps entirely
    def _compute():
        mask = nodes_ref[...] == names_ref[...]   # (TN, TM), head-independent
        emb_t = emb_ref[...]                      # (TM, D+1) bf16
        for h in range(H):                        # H is small -> static unroll
            x = a1_ref[:, h:h + 1] + a2_ref[h:h + 1, :]        # (TN, TM) logits
            x = jnp.maximum(x, jnp.float32(alpha) * x)         # LeakyReLU(alpha)
            s = jnp.where(mask, x, jnp.float32(_NEG_BIG))      # mask non-member instances

            # Online (streaming) softmax over the instance axis.
            m_prev = m_ref[:, h:h + 1]                         # (TN, 1)
            m_new = jnp.maximum(m_prev, jnp.max(s, axis=1, keepdims=True))
            corr = jnp.exp(m_prev - m_new)                     # (TN, 1)
            # Masked entries give exp(NEG_BIG - m_new) -> 0 for any row with a
            # member; fully-empty rows are zeroed at finalize (m stays NEG_BIG).
            p = jnp.exp(s - m_new).astype(jnp.bfloat16)        # (TN, TM)

            # One bf16 MXU matmul yields both the weighted embedding sum
            # (columns :D) and the softmax denominator (last column = sum of p).
            pe = jnp.dot(p, emb_t, preferred_element_type=jnp.float32)   # (TN, D+1)
            acc_ref[h] = corr * acc_ref[h] + pe
            m_ref[:, h:h + 1] = m_new

    @pl.when(j == pl.num_programs(1) - 1)
    def _finalize():
        outs = []
        for h in range(H):
            acc_h = acc_ref[h]                                          # (TN, D+1)
            denom = jnp.maximum(acc_h[:, D:D + 1], jnp.float32(1e-30))  # (TN, 1)
            o = acc_h[:, :D] * pl.reciprocal(denom, approx=True)        # attn @ emb
            o = jnp.where(o > 0, o, jnp.exp(jnp.minimum(o, 0.0)) - 1.0)  # ELU(alpha=1)
            o = jnp.where(m_ref[:, h:h + 1] == _NEG_BIG, jnp.float32(0.0), o)  # empty rows -> 0
            outs.append(o)
        out_ref[...] = jnp.concatenate(outs, axis=-1)   # single dense (TN, H*D) store


def _round_up(x, m):
    return (x + m - 1) // m * m


def message_aggregator(nodes, name_col, metapath_embedding, features,
                       w1, attn2, *, alpha, tn=256, tm=1024):
    """Forward pass of MessageAggregator (eval mode).

    nodes:(N,) int node ids, name_col:(M,) int per-instance node id,
    metapath_embedding:(M,D) f32, features:(N,D) f32,
    w1:(H,D) f32 (torch nn.Linear layout), attn2:(H,D) f32.

    Note: builds a data-dependent (sparsified) tile schedule, so it reads a few
    small scalars on the host — call it outside jit.
    """
    N, D = features.shape
    M = metapath_embedding.shape[0]
    H = w1.shape[0]
    f32 = jnp.float32

    features = features.astype(f32)
    emb = metapath_embedding.astype(f32)
    nodes_i32 = nodes.astype(jnp.int32)
    names_i32 = name_col.astype(jnp.int32)

    # Hoisted, node-independent projections: two plain XLA matmuls.
    a1 = features @ w1.astype(f32).T                     # (N, H)
    a2 = emb @ attn2.astype(f32).T                       # (M, H)

    # --- group metapath instances by the node row that owns them -------------
    # (assumes node ids in `nodes` are unique; duplicate ids fall back to a
    #  dense sweep below so semantics stay exact)
    match = names_i32[:, None] == nodes_i32[None, :]     # (M, N)
    has = jnp.any(match, axis=1)
    owner = jnp.where(has, jnp.argmax(match, axis=1).astype(jnp.int32),
                      jnp.int32(N))                      # unmatched -> past the end
    order = jnp.argsort(owner)
    owner_s = owner[order]
    names_s = names_i32[order]
    emb_s = emb[order]
    a2_s = a2[order]

    # --- tile sizes -----------------------------------------------------------
    TN = min(tn, _round_up(N, 8))
    if N >= 16 and _round_up(N, TN) // TN < 2:
        TN = _round_up((N + 1) // 2, 8)   # keep >=2 node tiles so v7x's 2nd TC has work
    TM = min(tm, _round_up(M, 128))
    Np = _round_up(N, TN)
    Mp = _round_up(M, TM)
    nt = Np // TN
    mt_total = Mp // TM

    # --- padded, lane/sublane-dense inputs ------------------------------------
    pad_node = jnp.iinfo(jnp.int32).min        # distinct sentinels: padded node rows
    pad_name = jnp.iinfo(jnp.int32).min + 1    # never match padded instance columns
    nodes_p = jnp.full((Np, 1), pad_node, jnp.int32).at[:N, 0].set(nodes_i32)
    names_p = jnp.full((1, Mp), pad_name, jnp.int32).at[0, :M].set(names_s)
    a1_p = jnp.zeros((Np, H), f32).at[:N, :].set(a1)
    a2_p = jnp.zeros((H, Mp), f32).at[:, :M].set(a2_s.T)
    # Ones column folds the softmax denominator into the PV matmul; bf16 is the
    # native MXU input dtype (accumulation stays f32 in-kernel).
    emb_aug = jnp.zeros((Mp, D + 1), jnp.bfloat16)
    emb_aug = emb_aug.at[:M, :D].set(emb_s.astype(jnp.bfloat16))
    emb_aug = emb_aug.at[:M, D].set(jnp.float32(1.0))

    # --- per-node-tile instance-tile schedule (scalar prefetch) ---------------
    owner_host = np.asarray(jax.device_get(owner_s))
    nodes_host = np.asarray(jax.device_get(nodes_i32))
    starts = np.arange(nt, dtype=np.int64) * TN
    row_start = np.searchsorted(owner_host, starts, side="left")
    row_end = np.searchsorted(owner_host, starts + TN, side="left")
    if np.unique(nodes_host).size == N:
        tile_start = np.minimum(row_start // TM, mt_total - 1)
        tile_end = (row_end + TM - 1) // TM
        tile_count = np.where(row_end > row_start, tile_end - row_start // TM, 0)
    else:
        # Duplicate node ids: an instance may feed several node rows, so the
        # contiguous-range assumption breaks -> dense instance sweep.
        tile_start = np.zeros((nt,), np.int64)
        tile_count = np.full((nt,), mt_total, np.int64)
    max_mt = max(int(tile_count.max()), 1)
    tile_start = jnp.asarray(tile_start, jnp.int32)
    tile_count = jnp.asarray(tile_count, jnp.int32)

    def mi_blk(ni, j, ts, tc):
        # Clamp skipped steps to the last useful block so its DMA is reused.
        return ts[ni] + jnp.minimum(j, jnp.maximum(tc[ni] - 1, 0))

    kernel = functools.partial(_message_aggregator_kernel,
                               alpha=float(alpha), num_heads=H, hidden_size=D)

    out = pl.pallas_call(
        kernel,
        out_shape=jax.ShapeDtypeStruct((Np, H * D), f32),
        grid_spec=pltpu.PrefetchScalarGridSpec(
            num_scalar_prefetch=2,
            grid=(nt, max_mt),                          # (node tiles, instance tiles per node tile)
            in_specs=[
                pl.BlockSpec((TN, 1), lambda ni, j, ts, tc: (ni, 0)),                       # node ids
                pl.BlockSpec((1, TM), lambda ni, j, ts, tc: (0, mi_blk(ni, j, ts, tc))),    # instance names
                pl.BlockSpec((TN, H), lambda ni, j, ts, tc: (ni, 0)),                       # a1 (node x head)
                pl.BlockSpec((H, TM), lambda ni, j, ts, tc: (0, mi_blk(ni, j, ts, tc))),    # a2 (head x instance)
                pl.BlockSpec((TM, D + 1), lambda ni, j, ts, tc: (mi_blk(ni, j, ts, tc), 0)),  # [emb | 1] tile
            ],
            out_specs=pl.BlockSpec((TN, H * D), lambda ni, j, ts, tc: (ni, 0)),
            scratch_shapes=[
                pltpu.VMEM((TN, H), f32),          # running max per head
                pltpu.VMEM((H, TN, D + 1), f32),   # running [weighted emb sum | softmax denom]
            ],
        ),
        compiler_params=pltpu.CompilerParams(
            dimension_semantics=("parallel", "arbitrary")),
    )(tile_start, tile_count, nodes_p, names_p, a1_p, a2_p, emb_aug)

    return out[:N]


def _reference(nodes, name_col, emb, feats, w1, attn2, alpha):
    """Pure-JAX f32 reference replicating the torch forward (attn_drop=0)."""
    outs = []
    for i in range(nodes.shape[0]):
        mask = (name_col == nodes[i])[:, None]            # (M, 1)
        a1 = feats[i] @ w1.T                              # (H,)
        a2 = emb @ attn2.T                                # (M, H)
        a = a1[None, :] + a2
        a = jnp.where(a >= 0, a, alpha * a)
        a_m = jnp.where(mask, a, -1e30)
        m = a_m.max(axis=0, keepdims=True)
        p = jnp.where(mask, jnp.exp(a_m - m), 0.0)
        s = p.sum(axis=0, keepdims=True)
        attn = p / jnp.maximum(s, 1e-30)
        h = attn.T @ emb
        h = jnp.where(h > 0, h, jnp.expm1(h))
        has_any = jnp.any(mask)
        outs.append(jnp.where(has_any, h.reshape(-1), jnp.zeros(h.size)))
    return jnp.stack(outs, axis=0)


if __name__ == "__main__":
    # Small shapes consistent with the module.
    num_heads = 4          # H
    hidden_size = 32       # D
    num_nodes = 8          # N
    num_instances = 16     # M  (rows of metapath_instances / metapath_embedding)
    alpha = 0.2            # LeakyReLU negative slope

    key = jax.random.PRNGKey(0)
    k1, k2, k3, k4, k5 = jax.random.split(key, 5)

    # Deterministic "xavier_normal_(gain=1.414)"-style parameter init.
    std1 = 1.414 * (2.0 / (hidden_size + num_heads)) ** 0.5
    w1 = std1 * jax.random.normal(k1, (num_heads, hidden_size), jnp.float32)      # attn1.weight
    std2 = 1.414 * (2.0 / (num_heads + hidden_size)) ** 0.5
    attn2 = std2 * jax.random.normal(k2, (num_heads, hidden_size), jnp.float32)   # attn2[0]

    # Inputs.
    nodes = jnp.arange(num_nodes, dtype=jnp.int32)                                # node ids
    name_col = jax.random.randint(k3, (num_instances,), 0, num_nodes, jnp.int32)  # df[name]
    metapath_embedding = jax.random.normal(k4, (num_instances, hidden_size), jnp.float32)
    features = jax.random.normal(k5, (num_nodes, hidden_size), jnp.float32)

    out = message_aggregator(nodes, name_col, metapath_embedding, features,
                             w1, attn2, alpha=alpha)
    out = jax.block_until_ready(out)

    ref = _reference(nodes, name_col, metapath_embedding, features, w1, attn2, alpha)
    assert out.shape == (num_nodes, num_heads * hidden_size)
    # bf16 PV matmul -> slightly looser tolerance than the pure-f32 reference.
    assert jnp.allclose(out, ref, atol=3e-2, rtol=3e-2), "mismatch vs reference"

    print("KERNEL_OK")
</pallas_src>

<mosaic_0001>
module attributes {stable_mosaic.version = 11 : i64} {
  func.func @_message_aggregator_kernel(%arg0: i32, %arg1: i32, %arg2: memref<1xi32, #tpu.memory_space<smem>>, %arg3: memref<1xi32, #tpu.memory_space<smem>>, %arg4: memref<8x1xi32, #tpu.memory_space<vmem>>, %arg5: memref<1x128xi32, #tpu.memory_space<vmem>>, %arg6: memref<8x4xf32, #tpu.memory_space<vmem>>, %arg7: memref<4x128xf32, #tpu.memory_space<vmem>>, %arg8: memref<128x33xbf16, #tpu.memory_space<vmem>>, %arg9: memref<8x128xf32, #tpu.memory_space<vmem>>, %arg10: memref<8x4xf32, #tpu.memory_space<vmem>>, %arg11: memref<4x8x33xf32, #tpu.memory_space<vmem>>) attributes {dimension_semantics = [#tpu.dimension_semantics<parallel>, #tpu.dimension_semantics<arbitrary>], iteration_bounds = array<i64: 1, 1>, scalar_prefetch = 2 : i64, scratch_operands = 2 : i64, tpu.core_type = #tpu.core_type<tc>, window_params = [{transform_indices = @transform_0, window_bounds = array<i64: 8, 1>}, {transform_indices = @transform_1, window_bounds = array<i64: 1, 128>}, {transform_indices = @transform_2, window_bounds = array<i64: 8, 4>}, {transform_indices = @transform_3, window_bounds = array<i64: 4, 128>}, {transform_indices = @transform_4, window_bounds = array<i64: 128, 33>}, {transform_indices = @transform_5, window_bounds = array<i64: 8, 128>}]} {
    %c0_i32 = arith.constant 0 : i32
    %0 = arith.cmpi eq, %arg1, %c0_i32 : i32
    %1 = arith.extui %0 : i1 to i32
    %c0_i32_0 = arith.constant 0 : i32
    %2 = arith.cmpi ne, %1, %c0_i32_0 : i32
    scf.if %2 {
      %cst = arith.constant -1.000000e+30 : f32
      %11 = vector.broadcast %cst : f32 to vector<8x4xf32>
      %c0 = arith.constant 0 : index
      %c0_4 = arith.constant 0 : index
      %12 = vector.load %arg10[%c0, %c0_4] : memref<8x4xf32, #tpu.memory_space<vmem>>, vector<8x4xf32>
      tpu.vector_store %arg10[%c0, %c0_4], %11 {strides = array<i32>} : memref<8x4xf32, #tpu.memory_space<vmem>>, vector<8x4xf32>,
      %cst_5 = arith.constant 0.000000e+00 : f32
      %13 = vector.broadcast %cst_5 : f32 to vector<4x8x33xf32>
      %c0_6 = arith.constant 0 : index
      %c0_7 = arith.constant 0 : index
      %c0_8 = arith.constant 0 : index
      %14 = vector.load %arg11[%c0_6, %c0_7, %c0_8] : memref<4x8x33xf32, #tpu.memory_space<vmem>>, vector<4x8x33xf32>
      tpu.vector_store %arg11[%c0_6, %c0_7, %c0_8], %13 {strides = array<i32>} : memref<4x8x33xf32, #tpu.memory_space<vmem>>, vector<4x8x33xf32>,
    } else {
    }
    %3 = arith.index_cast %arg0 : i32 to index
    %4 = memref.load %arg3[%3] : memref<1xi32, #tpu.memory_space<smem>>
    %5 = arith.cmpi slt, %arg1, %4 : i32
    %6 = arith.extui %5 : i1 to i32
    %c0_i32_1 = arith.constant 0 : i32
    %7 = arith.cmpi ne, %6, %c0_i32_1 : i32
    scf.if %7 {
      %c0 = arith.constant 0 : index
      %c0_4 = arith.constant 0 : index
      %11 = vector.load %arg4[%c0, %c0_4] : memref<8x1xi32, #tpu.memory_space<vmem>>, vector<8x1xi32>
      %c0_5 = arith.constant 0 : index
      %c0_6 = arith.constant 0 : index
      %12 = vector.load %arg5[%c0_5, %c0_6] : memref<1x128xi32, #tpu.memory_space<vmem>>, vector<1x128xi32>
      %13 = vector.broadcast %11 : vector<8x1xi32> to vector<8x128xi32>
      %14 = vector.broadcast %12 : vector<1x128xi32> to vector<8x128xi32>
      %15 = arith.cmpi eq, %13, %14 : vector<8x128xi32>
      %c0_7 = arith.constant 0 : index
      %c0_8 = arith.constant 0 : index
      %16 = vector.load %arg8[%c0_7, %c0_8] : memref<128x33xbf16, #tpu.memory_space<vmem>>, vector<128x33xbf16>
      %c0_9 = arith.constant 0 : index
      %c0_10 = arith.constant 0 : index
      %17 = vector.load %arg6[%c0_9, %c0_10] : memref<8x4xf32, #tpu.memory_space<vmem>>, vector<8x1xf32>
      %c0_11 = arith.constant 0 : index
      %c0_12 = arith.constant 0 : index
      %18 = vector.load %arg7[%c0_11, %c0_12] : memref<4x128xf32, #tpu.memory_space<vmem>>, vector<1x128xf32>
      %19 = vector.broadcast %17 : vector<8x1xf32> to vector<8x128xf32>
      %20 = vector.broadcast %18 : vector<1x128xf32> to vector<8x128xf32>
      %21 = arith.addf %19, %20 : vector<8x128xf32>
      %cst = arith.constant 2.000000e-01 : f32
      %22 = vector.broadcast %cst : f32 to vector<8x128xf32>
      %23 = arith.mulf %22, %21 : vector<8x128xf32>
      %24 = arith.maximumf %21, %23 : vector<8x128xf32>
      %cst_13 = arith.constant -1.000000e+30 : f32
      %25 = vector.broadcast %cst_13 : f32 to vector<8x128xf32>
      %26 = arith.select %15, %24, %25 : vector<8x128xi1>, vector<8x128xf32>
      %c0_14 = arith.constant 0 : index
      %c0_15 = arith.constant 0 : index
      %27 = vector.load %arg10[%c0_14, %c0_15] : memref<8x4xf32, #tpu.memory_space<vmem>>, vector<8x1xf32>
      %cst_16 = arith.constant dense<0xFF800000> : vector<8xf32>
      %28 = vector.multi_reduction <maximumf>, %26, %cst_16 [1] : vector<8x128xf32> to vector<8xf32>
      %29 = vector.shape_cast %28 : vector<8xf32> to vector<8x1xf32>
      %30 = arith.maximumf %27, %29 : vector<8x1xf32>
      %31 = arith.subf %27, %30 : vector<8x1xf32>
      %32 = math.exp %31 : vector<8x1xf32>
      %33 = vector.broadcast %30 : vector<8x1xf32> to vector<8x128xf32>
      %34 = arith.subf %26, %33 : vector<8x128xf32>
      %35 = math.exp %34 : vector<8x128xf32>
      %36 = arith.truncf %35 : vector<8x128xf32> to vector<8x128xbf16>
      %cst_17 = arith.constant dense<0.000000e+00> : vector<8x33xf32>
      %37 = tpu.matmul %36, %16, %cst_17 {dimension_numbers = #tpu.dot_dimension_numbers<[1], [0], [0], [1], [0, 0, 1, 1], [], []>} : vector<8x128xbf16>, vector<128x33xbf16>, vector<8x33xf32> -> vector<8x33xf32>
      %c0_18 = arith.constant 0 : index
      %c0_19 = arith.constant 0 : index
      %c0_20 = arith.constant 0 : index
      %38 = vector.load %arg11[%c0_18, %c0_19, %c0_20] : memref<4x8x33xf32, #tpu.memory_space<vmem>>, vector<1x8x33xf32>
      %39 = vector.shape_cast %38 : vector<1x8x33xf32> to vector<8x33xf32>
      %40 = vector.broadcast %32 : vector<8x1xf32> to vector<8x33xf32>
      %41 = arith.mulf %40, %39 : vector<8x33xf32>
      %42 = arith.addf %41, %37 : vector<8x33xf32>
      %c0_21 = arith.constant 0 : index
      %c0_22 = arith.constant 0 : index
      %c0_23 = arith.constant 0 : index
      %43 = vector.load %arg11[%c0_21, %c0_22, %c0_23] : memref<4x8x33xf32, #tpu.memory_space<vmem>>, vector<1x8x33xf32>
      %44 = vector.shape_cast %43 : vector<1x8x33xf32> to vector<8x33xf32>
      %45 = vector.shape_cast %42 : vector<8x33xf32> to vector<1x8x33xf32>
      tpu.vector_store %arg11[%c0_21, %c0_22, %c0_23], %45 {strides = array<i32>} : memref<4x8x33xf32, #tpu.memory_space<vmem>>, vector<1x8x33xf32>,
      %c0_24 = arith.constant 0 : index
      %c0_25 = arith.constant 0 : index
      %46 = vector.load %arg10[%c0_24, %c0_25] : memref<8x4xf32, #tpu.memory_space<vmem>>, vector<8x1xf32>
      tpu.vector_store %arg10[%c0_24, %c0_25], %30 {strides = array<i32>} : memref<8x4xf32, #tpu.memory_space<vmem>>, vector<8x1xf32>,
      %c0_26 = arith.constant 0 : index
      %c1 = arith.constant 1 : index
      %47 = vector.load %arg6[%c0_26, %c1] : memref<8x4xf32, #tpu.memory_space<vmem>>, vector<8x1xf32>
      %c1_27 = arith.constant 1 : index
      %c0_28 = arith.constant 0 : index
      %48 = vector.load %arg7[%c1_27, %c0_28] : memref<4x128xf32, #tpu.memory_space<vmem>>, vector<1x128xf32>
      %49 = vector.broadcast %47 : vector<8x1xf32> to vector<8x128xf32>
      %50 = vector.broadcast %48 : vector<1x128xf32> to vector<8x128xf32>
      %51 = arith.addf %49, %50 : vector<8x128xf32>
      %cst_29 = arith.constant 2.000000e-01 : f32
      %52 = vector.broadcast %cst_29 : f32 to vector<8x128xf32>
      %53 = arith.mulf %52, %51 : vector<8x128xf32>
      %54 = arith.maximumf %51, %53 : vector<8x128xf32>
      %cst_30 = arith.constant -1.000000e+30 : f32
      %55 = vector.broadcast %cst_30 : f32 to vector<8x128xf32>
      %56 = arith.select %15, %54, %55 : vector<8x128xi1>, vector<8x128xf32>
      %c0_31 = arith.constant 0 : index
      %c1_32 = arith.constant 1 : index
      %57 = vector.load %arg10[%c0_31, %c1_32] : memref<8x4xf32, #tpu.memory_space<vmem>>, vector<8x1xf32>
      %cst_33 = arith.constant dense<0xFF800000> : vector<8xf32>
      %58 = vector.multi_reduction <maximumf>, %56, %cst_33 [1] : vector<8x128xf32> to vector<8xf32>
      %59 = vector.shape_cast %58 : vector<8xf32> to vector<8x1xf32>
      %60 = arith.maximumf %57, %59 : vector<8x1xf32>
      %61 = arith.subf %57, %60 : vector<8x1xf32>
      %62 = math.exp %61 : vector<8x1xf32>
      %63 = vector.broadcast %60 : vector<8x1xf32> to vector<8x128xf32>
      %64 = arith.subf %56, %63 : vector<8x128xf32>
      %65 = math.exp %64 : vector<8x128xf32>
      %66 = arith.truncf %65 : vector<8x128xf32> to vector<8x128xbf16>
      %cst_34 = arith.constant dense<0.000000e+00> : vector<8x33xf32>
      %67 = tpu.matmul %66, %16, %cst_34 {dimension_numbers = #tpu.dot_dimension_numbers<[1], [0], [0], [1], [0, 0, 1, 1], [], []>} : vector<8x128xbf16>, vector<128x33xbf16>, vector<8x33xf32> -> vector<8x33xf32>
      %c1_35 = arith.constant 1 : index
      %c0_36 = arith.constant 0 : index
      %c0_37 = arith.constant 0 : index
      %68 = vector.load %arg11[%c1_35, %c0_36, %c0_37] : memref<4x8x33xf32, #tpu.memory_space<vmem>>, vector<1x8x33xf32>
      %69 = vector.shape_cast %68 : vector<1x8x33xf32> to vector<8x33xf32>
      %70 = vector.broadcast %62 : vector<8x1xf32> to vector<8x33xf32>
      %71 = arith.mulf %70, %69 : vector<8x33xf32>
      %72 = arith.addf %71, %67 : vector<8x33xf32>
      %c1_38 = arith.constant 1 : index
      %c0_39 = arith.constant 0 : index
      %c0_40 = arith.constant 0 : index
      %73 = vector.load %arg11[%c1_38, %c0_39, %c0_40] : memref<4x8x33xf32, #tpu.memory_space<vmem>>, vector<1x8x33xf32>
      %74 = vector.shape_cast %73 : vector<1x8x33xf32> to vector<8x33xf32>
      %75 = vector.shape_cast %72 : vector<8x33xf32> to vector<1x8x33xf32>
      tpu.vector_store %arg11[%c1_38, %c0_39, %c0_40], %75 {strides = array<i32>} : memref<4x8x33xf32, #tpu.memory_space<vmem>>, vector<1x8x33xf32>,
      %c0_41 = arith.constant 0 : index
      %c1_42 = arith.constant 1 : index
      %76 = vector.load %arg10[%c0_41, %c1_42] : memref<8x4xf32, #tpu.memory_space<vmem>>, vector<8x1xf32>
      tpu.vector_store %arg10[%c0_41, %c1_42], %60 {strides = array<i32>} : memref<8x4xf32, #tpu.memory_space<vmem>>, vector<8x1xf32>,
      %c0_43 = arith.constant 0 : index
      %c2 = arith.constant 2 : index
      %77 = vector.load %arg6[%c0_43, %c2] : memref<8x4xf32, #tpu.memory_space<vmem>>, vector<8x1xf32>
      %c2_44 = arith.constant 2 : index
      %c0_45 = arith.constant 0 : index
      %78 = vector.load %arg7[%c2_44, %c0_45] : memref<4x128xf32, #tpu.memory_space<vmem>>, vector<1x128xf32>
      %79 = vector.broadcast %77 : vector<8x1xf32> to vector<8x128xf32>
      %80 = vector.broadcast %78 : vector<1x128xf32> to vector<8x128xf32>
      %81 = arith.addf %79, %80 : vector<8x128xf32>
      %cst_46 = arith.constant 2.000000e-01 : f32
      %82 = vector.broadcast %cst_46 : f32 to vector<8x128xf32>
      %83 = arith.mulf %82, %81 : vector<8x128xf32>
      %84 = arith.maximumf %81, %83 : vector<8x128xf32>
      %cst_47 = arith.constant -1.000000e+30 : f32
      %85 = vector.broadcast %cst_47 : f32 to vector<8x128xf32>
      %86 = arith.select %15, %84, %85 : vector<8x128xi1>, vector<8x128xf32>
      %c0_48 = arith.constant 0 : index
      %c2_49 = arith.constant 2 : index
      %87 = vector.load %arg10[%c0_48, %c2_49] : memref<8x4xf32, #tpu.memory_space<vmem>>, vector<8x1xf32>
      %cst_50 = arith.constant dense<0xFF800000> : vector<8xf32>
      %88 = vector.multi_reduction <maximumf>, %86, %cst_50 [1] : vector<8x128xf32> to vector<8xf32>
      %89 = vector.shape_cast %88 : vector<8xf32> to vector<8x1xf32>
      %90 = arith.maximumf %87, %89 : vector<8x1xf32>
      %91 = arith.subf %87, %90 : vector<8x1xf32>
      %92 = math.exp %91 : vector<8x1xf32>
      %93 = vector.broadcast %90 : vector<8x1xf32> to vector<8x128xf32>
      %94 = arith.subf %86, %93 : vector<8x128xf32>
      %95 = math.exp %94 : vector<8x128xf32>
      %96 = arith.truncf %95 : vector<8x128xf32> to vector<8x128xbf16>
      %cst_51 = arith.constant dense<0.000000e+00> : vector<8x33xf32>
      %97 = tpu.matmul %96, %16, %cst_51 {dimension_numbers = #tpu.dot_dimension_numbers<[1], [0], [0], [1], [0, 0, 1, 1], [], []>} : vector<8x128xbf16>, vector<128x33xbf16>, vector<8x33xf32> -> vector<8x33xf32>
      %c2_52 = arith.constant 2 : index
      %c0_53 = arith.constant 0 : index
      %c0_54 = arith.constant 0 : index
      %98 = vector.load %arg11[%c2_52, %c0_53, %c0_54] : memref<4x8x33xf32, #tpu.memory_space<vmem>>, vector<1x8x33xf32>
      %99 = vector.shape_cast %98 : vector<1x8x33xf32> to vector<8x33xf32>
      %100 = vector.broadcast %92 : vector<8x1xf32> to vector<8x33xf32>
      %101 = arith.mulf %100, %99 : vector<8x33xf32>
      %102 = arith.addf %101, %97 : vector<8x33xf32>
      %c2_55 = arith.constant 2 : index
      %c0_56 = arith.constant 0 : index
      %c0_57 = arith.constant 0 : index
      %103 = vector.load %arg11[%c2_55, %c0_56, %c0_57] : memref<4x8x33xf32, #tpu.memory_space<vmem>>, vector<1x8x33xf32>
      %104 = vector.shape_cast %103 : vector<1x8x33xf32> to vector<8x33xf32>
      %105 = vector.shape_cast %102 : vector<8x33xf32> to vector<1x8x33xf32>
      tpu.vector_store %arg11[%c2_55, %c0_56, %c0_57], %105 {strides = array<i32>} : memref<4x8x33xf32, #tpu.memory_space<vmem>>, vector<1x8x33xf32>,
      %c0_58 = arith.constant 0 : index
      %c2_59 = arith.constant 2 : index
      %106 = vector.load %arg10[%c0_58, %c2_59] : memref<8x4xf32, #tpu.memory_space<vmem>>, vector<8x1xf32>
      tpu.vector_store %arg10[%c0_58, %c2_59], %90 {strides = array<i32>} : memref<8x4xf32, #tpu.memory_space<vmem>>, vector<8x1xf32>,
      %c0_60 = arith.constant 0 : index
      %c3 = arith.constant 3 : index
      %107 = vector.load %arg6[%c0_60, %c3] : memref<8x4xf32, #tpu.memory_space<vmem>>, vector<8x1xf32>
      %c3_61 = arith.constant 3 : index
      %c0_62 = arith.constant 0 : index
      %108 = vector.load %arg7[%c3_61, %c0_62] : memref<4x128xf32, #tpu.memory_space<vmem>>, vector<1x128xf32>
      %109 = vector.broadcast %107 : vector<8x1xf32> to vector<8x128xf32>
      %110 = vector.broadcast %108 : vector<1x128xf32> to vector<8x128xf32>
      %111 = arith.addf %109, %110 : vector<8x128xf32>
      %cst_63 = arith.constant 2.000000e-01 : f32
      %112 = vector.broadcast %cst_63 : f32 to vector<8x128xf32>
      %113 = arith.mulf %112, %111 : vector<8x128xf32>
      %114 = arith.maximumf %111, %113 : vector<8x128xf32>
      %cst_64 = arith.constant -1.000000e+30 : f32
      %115 = vector.broadcast %cst_64 : f32 to vector<8x128xf32>
      %116 = arith.select %15, %114, %115 : vector<8x128xi1>, vector<8x128xf32>
      %c0_65 = arith.constant 0 : index
      %c3_66 = arith.constant 3 : index
      %117 = vector.load %arg10[%c0_65, %c3_66] : memref<8x4xf32, #tpu.memory_space<vmem>>, vector<8x1xf32>
      %cst_67 = arith.constant dense<0xFF800000> : vector<8xf32>
      %118 = vector.multi_reduction <maximumf>, %116, %cst_67 [1] : vector<8x128xf32> to vector<8xf32>
      %119 = vector.shape_cast %118 : vector<8xf32> to vector<8x1xf32>
      %120 = arith.maximumf %117, %119 : vector<8x1xf32>
      %121 = arith.subf %117, %120 : vector<8x1xf32>
      %122 = math.exp %121 : vector<8x1xf32>
      %123 = vector.broadcast %120 : vector<8x1xf32> to vector<8x128xf32>
      %124 = arith.subf %116, %123 : vector<8x128xf32>
      %125 = math.exp %124 : vector<8x128xf32>
      %126 = arith.truncf %125 : vector<8x128xf32> to vector<8x128xbf16>
      %cst_68 = arith.constant dense<0.000000e+00> : vector<8x33xf32>
      %127 = tpu.matmul %126, %16, %cst_68 {dimension_numbers = #tpu.dot_dimension_numbers<[1], [0], [0], [1], [0, 0, 1, 1], [], []>} : vector<8x128xbf16>, vector<128x33xbf16>, vector<8x33xf32> -> vector<8x33xf32>
      %c3_69 = arith.constant 3 : index
      %c0_70 = arith.constant 0 : index
      %c0_71 = arith.constant 0 : index
      %128 = vector.load %arg11[%c3_69, %c0_70, %c0_71] : memref<4x8x33xf32, #tpu.memory_space<vmem>>, vector<1x8x33xf32>
      %129 = vector.shape_cast %128 : vector<1x8x33xf32> to vector<8x33xf32>
      %130 = vector.broadcast %122 : vector<8x1xf32> to vector<8x33xf32>
      %131 = arith.mulf %130, %129 : vector<8x33xf32>
      %132 = arith.addf %131, %127 : vector<8x33xf32>
      %c3_72 = arith.constant 3 : index
      %c0_73 = arith.constant 0 : index
      %c0_74 = arith.constant 0 : index
      %133 = vector.load %arg11[%c3_72, %c0_73, %c0_74] : memref<4x8x33xf32, #tpu.memory_space<vmem>>, vector<1x8x33xf32>
      %134 = vector.shape_cast %133 : vector<1x8x33xf32> to vector<8x33xf32>
      %135 = vector.shape_cast %132 : vector<8x33xf32> to vector<1x8x33xf32>
      tpu.vector_store %arg11[%c3_72, %c0_73, %c0_74], %135 {strides = array<i32>} : memref<4x8x33xf32, #tpu.memory_space<vmem>>, vector<1x8x33xf32>,
      %c0_75 = arith.constant 0 : index
      %c3_76 = arith.constant 3 : index
      %136 = vector.load %arg10[%c0_75, %c3_76] : memref<8x4xf32, #tpu.memory_space<vmem>>, vector<8x1xf32>
      tpu.vector_store %arg10[%c0_75, %c3_76], %120 {strides = array<i32>} : memref<8x4xf32, #tpu.memory_space<vmem>>, vector<8x1xf32>,
    } else {
    }
    %c0_i32_2 = arith.constant 0 : i32
    %8 = arith.cmpi eq, %arg1, %c0_i32_2 : i32
    %9 = arith.extui %8 : i1 to i32
    %c0_i32_3 = arith.constant 0 : i32
    %10 = arith.cmpi ne, %9, %c0_i32_3 : i32
    scf.if %10 {
      %c0 = arith.constant 0 : index
      %c0_4 = arith.constant 0 : index
      %c0_5 = arith.constant 0 : index
      %11 = vector.load %arg11[%c0, %c0_4, %c0_5] : memref<4x8x33xf32, #tpu.memory_space<vmem>>, vector<1x8x33xf32>
      %12 = vector.shape_cast %11 : vector<1x8x33xf32> to vector<8x33xf32>
      %13 = vector.extract_strided_slice %12 {offsets = [0, 32], sizes = [8, 1], strides = [1, 1]} : vector<8x33xf32> to vector<8x1xf32>
      %cst = arith.constant 1.000000e-30 : f32
      %14 = vector.broadcast %cst : f32 to vector<8x1xf32>
      %15 = arith.maximumf %13, %14 : vector<8x1xf32>
      %16 = vector.extract_strided_slice %12 {offsets = [0, 0], sizes = [8, 32], strides = [1, 1]} : vector<8x33xf32> to vector<8x32xf32>
      %17 = tpu.reciprocal %15 {approx = true} : vector<8x1xf32> -> vector<8x1xf32>
      %18 = vector.broadcast %17 : vector<8x1xf32> to vector<8x32xf32>
      %19 = arith.mulf %16, %18 : vector<8x32xf32>
      %cst_6 = arith.constant 0.000000e+00 : f32
      %20 = vector.broadcast %cst_6 : f32 to vector<8x32xf32>
      %21 = arith.cmpf ogt, %19, %20 : vector<8x32xf32>
      %cst_7 = arith.constant 0.000000e+00 : f32
      %22 = vector.broadcast %cst_7 : f32 to vector<8x32xf32>
      %23 = arith.minimumf %19, %22 : vector<8x32xf32>
      %24 = math.exp %23 : vector<8x32xf32>
      %cst_8 = arith.constant 1.000000e+00 : f32
      %25 = vector.broadcast %cst_8 : f32 to vector<8x32xf32>
      %26 = arith.subf %24, %25 : vector<8x32xf32>
      %27 = arith.select %21, %19, %26 : vector<8x32xi1>, vector<8x32xf32>
      %c0_9 = arith.constant 0 : index
      %c0_10 = arith.constant 0 : index
      %28 = vector.load %arg10[%c0_9, %c0_10] : memref<8x4xf32, #tpu.memory_space<vmem>>, vector<8x1xf32>
      %cst_11 = arith.constant -1.000000e+30 : f32
      %29 = vector.broadcast %cst_11 : f32 to vector<8x1xf32>
      %30 = arith.cmpf oeq, %28, %29 : vector<8x1xf32>
      %cst_12 = arith.constant 0.000000e+00 : f32
      %31 = vector.shape_cast %30 : vector<8x1xi1> to vector<8x1xi1>
      %32 = vector.broadcast %31 : vector<8x1xi1> to vector<8x32xi1>
      %33 = vector.broadcast %cst_12 : f32 to vector<8x32xf32>
      %34 = arith.select %32, %33, %27 : vector<8x32xi1>, vector<8x32xf32>
      %c1 = arith.constant 1 : index
      %c0_13 = arith.constant 0 : index
      %c0_14 = arith.constant 0 : index
      %35 = vector.load %arg11[%c1, %c0_13, %c0_14] : memref<4x8x33xf32, #tpu.memory_space<vmem>>, vector<1x8x33xf32>
      %36 = vector.shape_cast %35 : vector<1x8x33xf32> to vector<8x33xf32>
      %37 = vector.extract_strided_slice %36 {offsets = [0, 32], sizes = [8, 1], strides = [1, 1]} : vector<8x33xf32> to vector<8x1xf32>
      %cst_15 = arith.constant 1.000000e-30 : f32
      %38 = vector.broadcast %cst_15 : f32 to vector<8x1xf32>
      %39 = arith.maximumf %37, %38 : vector<8x1xf32>
      %40 = vector.extract_strided_slice %36 {offsets = [0, 0], sizes = [8, 32], strides = [1, 1]} : vector<8x33xf32> to vector<8x32xf32>
      %41 = tpu.reciprocal %39 {approx = true} : vector<8x1xf32> -> vector<8x1xf32>
      %42 = vector.broadcast %41 : vector<8x1xf32> to vector<8x32xf32>
      %43 = arith.mulf %40, %42 : vector<8x32xf32>
      %cst_16 = arith.constant 0.000000e+00 : f32
      %44 = vector.broadcast %cst_16 : f32 to vector<8x32xf32>
      %45 = arith.cmpf ogt, %43, %44 : vector<8x32xf32>
      %cst_17 = arith.constant 0.000000e+00 : f32
      %46 = vector.broadcast %cst_17 : f32 to vector<8x32xf32>
      %47 = arith.minimumf %43, %46 : vector<8x32xf32>
      %48 = math.exp %47 : vector<8x32xf32>
      %cst_18 = arith.constant 1.000000e+00 : f32
      %49 = vector.broadcast %cst_18 : f32 to vector<8x32xf32>
      %50 = arith.subf %48, %49 : vector<8x32xf32>
      %51 = arith.select %45, %43, %50 : vector<8x32xi1>, vector<8x32xf32>
      %c0_19 = arith.constant 0 : index
      %c1_20 = arith.constant 1 : index
      %52 = vector.load %arg10[%c0_19, %c1_20] : memref<8x4xf32, #tpu.memory_space<vmem>>, vector<8x1xf32>
      %cst_21 = arith.constant -1.000000e+30 : f32
      %53 = vector.broadcast %cst_21 : f32 to vector<8x1xf32>
      %54 = arith.cmpf oeq, %52, %53 : vector<8x1xf32>
      %cst_22 = arith.constant 0.000000e+00 : f32
      %55 = vector.shape_cast %54 : vector<8x1xi1> to vector<8x1xi1>
      %56 = vector.broadcast %55 : vector<8x1xi1> to vector<8x32xi1>
      %57 = vector.broadcast %cst_22 : f32 to vector<8x32xf32>
      %58 = arith.select %56, %57, %51 : vector<8x32xi1>, vector<8x32xf32>
      %c2 = arith.constant 2 : index
      %c0_23 = arith.constant 0 : index
      %c0_24 = arith.constant 0 : index
      %59 = vector.load %arg11[%c2, %c0_23, %c0_24] : memref<4x8x33xf32, #tpu.memory_space<vmem>>, vector<1x8x33xf32>
      %60 = vector.shape_cast %59 : vector<1x8x33xf32> to vector<8x33xf32>
      %61 = vector.extract_strided_slice %60 {offsets = [0, 32], sizes = [8, 1], strides = [1, 1]} : vector<8x33xf32> to vector<8x1xf32>
      %cst_25 = arith.constant 1.000000e-30 : f32
      %62 = vector.broadcast %cst_25 : f32 to vector<8x1xf32>
      %63 = arith.maximumf %61, %62 : vector<8x1xf32>
      %64 = vector.extract_strided_slice %60 {offsets = [0, 0], sizes = [8, 32], strides = [1, 1]} : vector<8x33xf32> to vector<8x32xf32>
      %65 = tpu.reciprocal %63 {approx = true} : vector<8x1xf32> -> vector<8x1xf32>
      %66 = vector.broadcast %65 : vector<8x1xf32> to vector<8x32xf32>
      %67 = arith.mulf %64, %66 : vector<8x32xf32>
      %cst_26 = arith.constant 0.000000e+00 : f32
      %68 = vector.broadcast %cst_26 : f32 to vector<8x32xf32>
      %69 = arith.cmpf ogt, %67, %68 : vector<8x32xf32>
      %cst_27 = arith.constant 0.000000e+00 : f32
      %70 = vector.broadcast %cst_27 : f32 to vector<8x32xf32>
      %71 = arith.minimumf %67, %70 : vector<8x32xf32>
      %72 = math.exp %71 : vector<8x32xf32>
      %cst_28 = arith.constant 1.000000e+00 : f32
      %73 = vector.broadcast %cst_28 : f32 to vector<8x32xf32>
      %74 = arith.subf %72, %73 : vector<8x32xf32>
      %75 = arith.select %69, %67, %74 : vector<8x32xi1>, vector<8x32xf32>
      %c0_29 = arith.constant 0 : index
      %c2_30 = arith.constant 2 : index
      %76 = vector.load %arg10[%c0_29, %c2_30] : memref<8x4xf32, #tpu.memory_space<vmem>>, vector<8x1xf32>
      %cst_31 = arith.constant -1.000000e+30 : f32
      %77 = vector.broadcast %cst_31 : f32 to vector<8x1xf32>
      %78 = arith.cmpf oeq, %76, %77 : vector<8x1xf32>
      %cst_32 = arith.constant 0.000000e+00 : f32
      %79 = vector.shape_cast %78 : vector<8x1xi1> to vector<8x1xi1>
      %80 = vector.broadcast %79 : vector<8x1xi1> to vector<8x32xi1>
      %81 = vector.broadcast %cst_32 : f32 to vector<8x32xf32>
      %82 = arith.select %80, %81, %75 : vector<8x32xi1>, vector<8x32xf32>
      %c3 = arith.constant 3 : index
      %c0_33 = arith.constant 0 : index
      %c0_34 = arith.constant 0 : index
      %83 = vector.load %arg11[%c3, %c0_33, %c0_34] : memref<4x8x33xf32, #tpu.memory_space<vmem>>, vector<1x8x33xf32>
      %84 = vector.shape_cast %83 : vector<1x8x33xf32> to vector<8x33xf32>
      %85 = vector.extract_strided_slice %84 {offsets = [0, 32], sizes = [8, 1], strides = [1, 1]} : vector<8x33xf32> to vector<8x1xf32>
      %cst_35 = arith.constant 1.000000e-30 : f32
      %86 = vector.broadcast %cst_35 : f32 to vector<8x1xf32>
      %87 = arith.maximumf %85, %86 : vector<8x1xf32>
      %88 = vector.extract_strided_slice %84 {offsets = [0, 0], sizes = [8, 32], strides = [1, 1]} : vector<8x33xf32> to vector<8x32xf32>
      %89 = tpu.reciprocal %87 {approx = true} : vector<8x1xf32> -> vector<8x1xf32>
      %90 = vector.broadcast %89 : vector<8x1xf32> to vector<8x32xf32>
      %91 = arith.mulf %88, %90 : vector<8x32xf32>
      %cst_36 = arith.constant 0.000000e+00 : f32
      %92 = vector.broadcast %cst_36 : f32 to vector<8x32xf32>
      %93 = arith.cmpf ogt, %91, %92 : vector<8x32xf32>
      %cst_37 = arith.constant 0.000000e+00 : f32
      %94 = vector.broadcast %cst_37 : f32 to vector<8x32xf32>
      %95 = arith.minimumf %91, %94 : vector<8x32xf32>
      %96 = math.exp %95 : vector<8x32xf32>
      %cst_38 = arith.constant 1.000000e+00 : f32
      %97 = vector.broadcast %cst_38 : f32 to vector<8x32xf32>
      %98 = arith.subf %96, %97 : vector<8x32xf32>
      %99 = arith.select %93, %91, %98 : vector<8x32xi1>, vector<8x32xf32>
      %c0_39 = arith.constant 0 : index
      %c3_40 = arith.constant 3 : index
      %100 = vector.load %arg10[%c0_39, %c3_40] : memref<8x4xf32, #tpu.memory_space<vmem>>, vector<8x1xf32>
      %cst_41 = arith.constant -1.000000e+30 : f32
      %101 = vector.broadcast %cst_41 : f32 to vector<8x1xf32>
      %102 = arith.cmpf oeq, %100, %101 : vector<8x1xf32>
      %cst_42 = arith.constant 0.000000e+00 : f32
      %103 = vector.shape_cast %102 : vector<8x1xi1> to vector<8x1xi1>
      %104 = vector.broadcast %103 : vector<8x1xi1> to vector<8x32xi1>
      %105 = vector.broadcast %cst_42 : f32 to vector<8x32xf32>
      %106 = arith.select %104, %105, %99 : vector<8x32xi1>, vector<8x32xf32>
      %107 = tpu.concatenate %34, %58, %82, %106 in 1 : vector<8x32xf32>, vector<8x32xf32>, vector<8x32xf32>, vector<8x32xf32> -> vector<8x128xf32>
      %c0_43 = arith.constant 0 : index
      %c0_44 = arith.constant 0 : index
      %108 = vector.load %arg9[%c0_43, %c0_44] : memref<8x128xf32, #tpu.memory_space<vmem>>, vector<8x128xf32>
      tpu.vector_store %arg9[%c0_43, %c0_44], %107 {strides = array<i32>} : memref<8x128xf32, #tpu.memory_space<vmem>>, vector<8x128xf32>,
    } else {
    }
    return
  }
  func.func @transform_0(%arg0: i32, %arg1: i32, %arg2: memref<1xi32, #tpu.memory_space<smem>>, %arg3: memref<1xi32, #tpu.memory_space<smem>>) -> (i32, i32) {
    %c0_i32 = arith.constant 0 : i32
    %c0_i32_0 = arith.constant 0 : i32
    return %arg0, %c0_i32 : i32, i32
  }
  func.func @transform_1(%arg0: i32, %arg1: i32, %arg2: memref<1xi32, #tpu.memory_space<smem>>, %arg3: memref<1xi32, #tpu.memory_space<smem>>) -> (i32, i32) {
    %0 = arith.index_cast %arg0 : i32 to index
    %1 = memref.load %arg2[%0] : memref<1xi32, #tpu.memory_space<smem>>
    %2 = arith.index_cast %arg0 : i32 to index
    %3 = memref.load %arg3[%2] : memref<1xi32, #tpu.memory_space<smem>>
    %c1_i32 = arith.constant 1 : i32
    %4 = arith.subi %3, %c1_i32 : i32
    %c0_i32 = arith.constant 0 : i32
    %5 = arith.maxsi %4, %c0_i32 : i32
    %6 = arith.minsi %arg1, %5 : i32
    %7 = arith.addi %1, %6 : i32
    %c0_i32_0 = arith.constant 0 : i32
    %c0_i32_1 = arith.constant 0 : i32
    return %c0_i32_0, %7 : i32, i32
  }
  func.func @transform_2(%arg0: i32, %arg1: i32, %arg2: memref<1xi32, #tpu.memory_space<smem>>, %arg3: memref<1xi32, #tpu.memory_space<smem>>) -> (i32, i32) {
    %c0_i32 = arith.constant 0 : i32
    %c0_i32_0 = arith.constant 0 : i32
    return %arg0, %c0_i32 : i32, i32
  }
  func.func @transform_3(%arg0: i32, %arg1: i32, %arg2: memref<1xi32, #tpu.memory_space<smem>>, %arg3: memref<1xi32, #tpu.memory_space<smem>>) -> (i32, i32) {
    %0 = arith.index_cast %arg0 : i32 to index
    %1 = memref.load %arg2[%0] : memref<1xi32, #tpu.memory_space<smem>>
    %2 = arith.index_cast %arg0 : i32 to index
    %3 = memref.load %arg3[%2] : memref<1xi32, #tpu.memory_space<smem>>
    %c1_i32 = arith.constant 1 : i32
    %4 = arith.subi %3, %c1_i32 : i32
    %c0_i32 = arith.constant 0 : i32
    %5 = arith.maxsi %4, %c0_i32 : i32
    %6 = arith.minsi %arg1, %5 : i32
    %7 = arith.addi %1, %6 : i32
    %c0_i32_0 = arith.constant 0 : i32
    %c0_i32_1 = arith.constant 0 : i32
    return %c0_i32_0, %7 : i32, i32
  }
  func.func @transform_4(%arg0: i32, %arg1: i32, %arg2: memref<1xi32, #tpu.memory_space<smem>>, %arg3: memref<1xi32, #tpu.memory_space<smem>>) -> (i32, i32) {
    %0 = arith.index_cast %arg0 : i32 to index
    %1 = memref.load %arg2[%0] : memref<1xi32, #tpu.memory_space<smem>>
    %2 = arith.index_cast %arg0 : i32 to index
    %3 = memref.load %arg3[%2] : memref<1xi32, #tpu.memory_space<smem>>
    %c1_i32 = arith.constant 1 : i32
    %4 = arith.subi %3, %c1_i32 : i32
    %c0_i32 = arith.constant 0 : i32
    %5 = arith.maxsi %4, %c0_i32 : i32
    %6 = arith.minsi %arg1, %5 : i32
    %7 = arith.addi %1, %6 : i32
    %c0_i32_0 = arith.constant 0 : i32
    %c0_i32_1 = arith.constant 0 : i32
    return %7, %c0_i32_0 : i32, i32
  }
  func.func @transform_5(%arg0: i32, %arg1: i32, %arg2: memref<1xi32, #tpu.memory_space<smem>>, %arg3: memref<1xi32, #tpu.memory_space<smem>>) -> (i32, i32) {
    %c0_i32 = arith.constant 0 : i32
    %c0_i32_0 = arith.constant 0 : i32
    return %arg0, %c0_i32 : i32, i32
  }
}

</mosaic_0001>

<bundles_post_ra>
// kernel: tpu_custom_call.1
= control target key start
LH: loop header
LB: loop body
LE: loop exit
PB: predicated region body
PF: predicated region fallthrough
CT: control target
= control target key end

     0   :  { %14 = vsyncpa [#allocation8], 0  ;;  %vm187_vm0 = vcmask 31744   ;;  %v780_v0 = vmov -1e+30   ;;  %vm189_vm1 = vcmask 269312   ;;  %s919_s0 = inlined_call_operand.<no memory space> [shape: s32[1], index: 0, kind: input, shape index: {}]   ;;  %s920_s1 = inlined_call_operand.<no memory space> [shape: s32[1], index: 1, kind: input, shape index: {}]   ;;  %s921_s2 = inlined_call_operand.vmem [shape: s32[8,1], index: 2, kind: input, shape index: {}]   ;;  %s922_s3 = inlined_call_operand.vmem [shape: s32[1,128], index: 3, kind: input, shape index: {}]   ;;  %s923_s4 = inlined_call_operand.vmem [shape: f32[8,4], index: 4, kind: input, shape index: {}]   ;;  %s924_s5 = inlined_call_operand.vmem [shape: f32[4,128], index: 5, kind: input, shape index: {}]   ;;  %s925_s6 = inlined_call_operand.vmem [shape: bf16[128,33], index: 6, kind: input, shape index: {}]   ;;  %s926_s7 = inlined_call_operand.hbm [shape: f32[8,128], index: 7, kind: output, shape index: {}]  }
   0x1   :  { %s621_s26 = sadd.s32 4294967295, %s920_s1  ;;  %188 = vst.msk [vmem:[#allocation2] sm:$0xff] %vm187_vm0, %v780_v0  ;;  %v781_v1 = vmov 0.0   ;;  %p631_p3 = scmp.le.s32.totalorder %s920_s1, 0 }
   0x2   :  { %p125_p0 = scmp.gt.s32.totalorder %s621_s26, 0  ;;  %190 = vst.msk [vmem:[#allocation3] sm:$0xff] %vm189_vm1, %v781_v1 }
   0x3   :  { %191 = vst.msk [vmem:[#allocation3 + $0x8] sm:$0xff] %vm189_vm1, %v781_v1 }
   0x4   :  { %s928_s26 = smov (!%p125_p0, %s621_s26), 0  ;;  %192 = vst.msk [vmem:[#allocation3 + $0x10] sm:$0xff] %vm189_vm1, %v781_v1 }
   0x5   :  { %s930_s26 = smov (%p125_p0, %s928_s26), 0  ;;  %193 = vst.msk [vmem:[#allocation3 + $0x18] sm:$0xff] %vm189_vm1, %v781_v1 }
   0x6   :  { %s129_s29 = sadd.s32 %s930_s26, %s919_s0 }
   0x7   :  { %p130_p1 = scmp.lt.s32.totalorder %s129_s29, 0  ;;  %s628_s30 = sshll.u32 %s129_s29, 4 }
   0x8   :  { %p170_p2 = scmp.lt.s32.totalorder %s628_s30, 15  ;;  %198 = sbr.rel (%p631_p3) target bundleno = 556 (0x22c), region = 29 }
   0x9   :  { %s932_s29 = smov (!%p130_p1, %s129_s29), 0 }
   0xa   :  { %s934_s30 = smov (!%p170_p2, %s628_s30), 15  ;;  %s132_s10 = scalar_lea.vmem %s922_s3, %s932_s29 }
   0xb   :  { %s625_s11 = sshll.u32 %s932_s29, 2  ;;  %s629_s15 = sshll.u32 %s934_s30, 2 }
   0xc   :  { %s855_s14 = scalar_lea.vmem %s924_s5, %s625_s11  ;;  %s860_s17 = scalar_lea.vmem %s925_s6, %s629_s15 }
   0xd   :  { %v323_v2 = vld [vmem:[%s923_s4] sm:$0xff]  ;;  %v782_v3 = vmov 1   ;;  %v783_v4 = vmov 0   ;;  %v784_v5 = vmov 3   ;;  %v785_v7 = vmov 2   ;;  %v684_v43 = vld [vmem:[%s860_s17 + $0x38] sm:$0xff] }
   0xe   :  { %701 = vset.pattern.permute.xlu1 %v782_v3  ;;  %700 = vset.pattern.permute.xlu0 %v783_v4  ;;  %v199_v6 = vld [vmem:[%s921_s2] sm:$0xff]  ;;  %vm321_vm3 = vcmask 7168   ;;  %vm374_vm4 = vcmask 15368   ;;  %v683_v44 = vld [vmem:[%s860_s17 + $0x30] sm:$0xff]  ;;  %vm427_vm5 = vcmask 23568   ;;  %v682_v49 = vld [vmem:[%s860_s17 + $0x28] sm:$0xff] }
   0xf   :  { %327 = vperm.xlu1 %701, %v323_v2   ;;  %226 = vperm.xlu0 %700, %v323_v2   ;;  %v710_v8 = vld [vmem:[%s855_s14] ss:$0 sm:$0xff]  ;;  %v711_v9 = vld [vmem:[%s855_s14 + $0x1] ss:$0 sm:$0xff]  ;;  %v712_v14 = vld [vmem:[%s855_s14 + $0x3] ss:$0 sm:$0xff] }
  0x10   :  { %703 = vset.pattern.permute.xlu2 %v784_v5  ;;  %v713_v18 = vld [vmem:[%s132_s10] ss:$0 sm:$0xff]  ;;  %v714_v20 = vld [vmem:[%s855_s14 + $0x2] ss:$0 sm:$0xff]  ;;  %404 = vmatpush.bf16.msra.mxu2 %v684_v43  ;;  %vm480_vm6 = vcmask 31768   ;;  %v680_v57 = vld [vmem:[%s860_s17 + $0x18] sm:$0xff] }
  0x11   :  { %433 = vperm.xlu2 %703, %v323_v2   ;;  %v234_v34 = vld [vmem:[#allocation2] sm:$0xff]  ;;  %298 = vmatpush.bf16.msra.mxu0 %v684_v43  ;;  %v679_v63 = vld [vmem:[%s860_s17 + $0x10] sm:$0xff]  ;;  %v678_v0 = vld [vmem:[%s860_s17 + $0x8] sm:$0xff] }
  0x12   :  { %351 = vmatpush.bf16.msra.mxu1 %v684_v43  ;;  %457 = vmatpush.bf16.msra.mxu3 %v684_v43  ;;  %v681_v52 = vld [vmem:[%s860_s17 + $0x20] sm:$0xff] }
  0x13   :  { %v677_v1 = vld [vmem:[%s860_s17] sm:$0xff] }
  0x14   :  { %405 = vmatpush.bf16.msra.mxu2 %v683_v44 }
  0x15   :  { %299 = vmatpush.bf16.msra.mxu0 %v683_v44 }
  0x16   :  { %352 = vmatpush.bf16.msra.mxu1 %v683_v44  ;;  %458 = vmatpush.bf16.msra.mxu3 %v683_v44 }
  0x17   :  { %702 = vset.pattern.permute.xlu1 %v785_v7  ;;  %202 = vperm.xlu0 %700, %v199_v6  }
  0x18   :  { %380 = vperm.xlu1 %702, %v323_v2   ;;  %406 = vmatpush.bf16.msra.mxu2 %v682_v49 }
  0x19   :  { %704 = vset.pattern.permute.xlu2 %v785_v7  ;;  %300 = vmatpush.bf16.msra.mxu0 %v682_v49 }
  0x1a   :  { %353 = vmatpush.bf16.msra.mxu1 %v682_v49  ;;  %459 = vmatpush.bf16.msra.mxu3 %v682_v49 }
  0x1c   :  { %407 = vmatpush.bf16.msra.mxu2 %v681_v52 }
  0x1d   :  { %301 = vmatpush.bf16.msra.mxu0 %v681_v52 }
  0x1e   :  { %354 = vmatpush.bf16.msra.mxu1 %v681_v52  ;;  %460 = vmatpush.bf16.msra.mxu3 %v681_v52 }
  0x1f   :  { %705 = vset.pattern.permute.xlu0 %v784_v5 }
  0x20   :  { %706 = vset.pattern.permute.xlu1 %v783_v4  ;;  %408 = vmatpush.bf16.msra.mxu2 %v680_v57 }
  0x21   :  { %302 = vmatpush.bf16.msra.mxu0 %v680_v57 }
  0x22   :  { %355 = vmatpush.bf16.msra.mxu1 %v680_v57  ;;  %461 = vmatpush.bf16.msra.mxu3 %v680_v57 }
  0x24   :  { %409 = vmatpush.bf16.msra.mxu2 %v679_v63 }
  0x25   :  { %303 = vmatpush.bf16.msra.mxu0 %v679_v63 }
  0x26   :  { %356 = vmatpush.bf16.msra.mxu1 %v679_v63  ;;  %462 = vmatpush.bf16.msra.mxu3 %v679_v63 }
  0x28   :  { %410 = vmatpush.bf16.msra.mxu2 %v678_v0 }
  0x29   :  { %304 = vmatpush.bf16.msra.mxu0 %v678_v0 }
  0x2a   :  { %357 = vmatpush.bf16.msra.mxu1 %v678_v0  ;;  %463 = vmatpush.bf16.msra.mxu3 %v678_v0 }
  0x2c   :  { %411 = vmatpush.bf16.msra.mxu2 %v677_v1 }
  0x2d   :  { %305 = vmatpush.bf16.msra.mxu0 %v677_v1 }
  0x2e   :  { %358 = vmatpush.bf16.msra.mxu1 %v677_v1  ;;  %464 = vmatpush.bf16.msra.mxu3 %v677_v1 }
  0x6b   :  { %v434_v16 = vpop.permute.xlu2 %433 }
  0x6c   :  { %v437_v19 = vadd.f32 %v712_v14, %v434_v16 }
  0x6e   :  { %v438_v25 = vmul.f32 0.2, %v437_v19 }
  0x70   :  { %v439_v31 = vmax.f32 %v437_v19, %v438_v25 }
  0x81   :  { %v227_v10 = vpop.permute.xlu0 %226  ;;  %v328_v11 = vpop.permute.xlu1 %327 }
  0x82   :  { %v230_v12 = vadd.f32 %v710_v8, %v227_v10  ;;  %v331_v13 = vadd.f32 %v711_v9, %v328_v11 }
  0x84   :  { %v332_v15 = vmul.f32 0.2, %v331_v13  ;;  %v231_v17 = vmul.f32 0.2, %v230_v12 }
  0x86   :  { %v333_v21 = vmax.f32 %v331_v13, %v332_v15  ;;  %v232_v23 = vmax.f32 %v230_v12, %v231_v17 }
  0x89   :  { %v203_v22 = vpop.permute.xlu0 %202 }
  0x8a   :  { %vm205_vm2 = vcmp.eq.s32.totalorder %v203_v22, %v713_v18  ;;  %v381_v24 = vpop.permute.xlu1 %380 }
  0x8b   :  { %v384_v26 = vadd.f32 %v714_v20, %v381_v24  ;;  %v885_v27 = vsel %vm205_vm2, %v333_v21, -1e+30  ;;  %v887_v28 = vsel %vm205_vm2, %v232_v23, -1e+30  ;;  %v894_v33 = vsel %vm205_vm2, %v439_v31, -1e+30 }
  0x8c   :  { %336 = vmax.xlane.f32.xlu0 %v885_v27  ;;  %235 = vmax.xlane.f32.xlu2 %v887_v28  ;;  %v311_v23 = vld [vmem:[#allocation3] sm:$0xff]  ;;  %v418_v24 = vld [vmem:[#allocation3 + $0x10] sm:$0xff] }
  0x8d   :  { %v385_v29 = vmul.f32 0.2, %v384_v26 }
  0x8f   :  { %v386_v30 = vmax.f32 %v384_v26, %v385_v29 }
  0x91   :  { %v891_v32 = vsel %vm205_vm2, %v386_v30, -1e+30 }
  0x92   :  { %389 = vmax.xlane.f32.xlu1 %v891_v32 }
  0x94   :  { %442 = vmax.xlane.f32.xlu2 %v894_v33 }
  0xff   :  { %v236_v35 = vpop.xlane.xlu2 %235  ;;  %v337_v39 = vpop.xlane.xlu0 %336 }
 0x100   :  { %v237_v36 = vmax.f32 %v234_v34, %v236_v35 }
 0x102   :  { %v238_v37 = vsub.f32 %v234_v34, %v237_v36  ;;  %322 = vst.msk [vmem:[#allocation2] sm:$0xff] %vm321_vm3, %v237_v36  ;;  %243 = vperm.xlu1 %706, %v237_v36  }
 0x104   :  { %v239_v38 = vmul.f32 1.442695, %v238_v37 }
 0x105   :  { %v390_v45 = vpop.xlane.xlu1 %389 }
 0x106   :  { %715 = vpow2.f32 %v239_v38 }
 0x107   :  { %v443_v55 = vpop.xlane.xlu2 %442 }
 0x109   :  { %v335_v40 = vld [vmem:[#allocation2] sm:$0xff] }
 0x10a   :  { %v338_v41 = vmax.f32 %v335_v40, %v337_v39 }
 0x10c   :  { %v716_v42 = vpop.eup %715  ;;  %375 = vst.msk [vmem:[#allocation2] sm:$0xff] %vm374_vm4, %v338_v41  ;;  %v339_v50 = vsub.f32 %v335_v40, %v338_v41  ;;  %v471_v40 = vld [vmem:[#allocation3 + $0x18] sm:$0xff] }
 0x10d   :  { %314 = vperm.xlu1 %706, %v716_v42  }
 0x10e   :  { %v340_v53 = vmul.f32 1.442695, %v339_v50 }
 0x113   :  { %v388_v46 = vld [vmem:[#allocation2] sm:$0xff] }
 0x114   :  { %v391_v47 = vmax.f32 %v388_v46, %v390_v45 }
 0x115   :  { %708 = vset.pattern.permute.xlu1 %v785_v7 }
 0x116   :  { %v392_v48 = vsub.f32 %v388_v46, %v391_v47  ;;  %428 = vst.msk [vmem:[#allocation2] sm:$0xff] %vm427_vm5, %v391_v47  ;;  %397 = vperm.xlu2 %704, %v391_v47  }
 0x118   :  { %v393_v51 = vmul.f32 1.442695, %v392_v48 }
 0x11a   :  { %717 = vpow2.f32 %v393_v51 }
 0x11b   :  { %719 = vpow2.f32 %v340_v53 }
 0x11d   :  { %v441_v54 = vld [vmem:[#allocation2] sm:$0xff] }
 0x11e   :  { %v444_v56 = vmax.f32 %v441_v54, %v443_v55  ;;  %707 = vset.pattern.permute.xlu2 %v782_v3 }
 0x11f   :  { %344 = vperm.xlu2 %707, %v338_v41  }
 0x120   :  { %v718_v58 = vpop.eup %717  ;;  %481 = vst.msk [vmem:[#allocation2] sm:$0xff] %vm480_vm6, %v444_v56  ;;  %450 = vperm.xlu0 %705, %v444_v56   ;;  %v445_v59 = vsub.f32 %v441_v54, %v444_v56 }
 0x121   :  { %421 = vperm.xlu1 %708, %v718_v58   ;;  %v720_v61 = vpop.eup %719 }
 0x122   :  { %v446_v60 = vmul.f32 1.442695, %v445_v59 }
 0x124   :  { %721 = vpow2.f32 %v446_v60 }
 0x127   :  { %368 = vperm.xlu2 %707, %v720_v61  }
 0x12a   :  { %v722_v62 = vpop.eup %721 }
 0x12f   :  { %709 = vset.pattern.permute.xlu2 %v784_v5 }
 0x130   :  { %474 = vperm.xlu2 %709, %v722_v62  }
 0x170   :  { %v398_v2 = vpop.permute.xlu2 %397 }
 0x171   :  { %v400_v3 = vsub.f32 %v891_v32, %v398_v2 }
 0x173   :  { %v401_v4 = vmul.f32 1.442695, %v400_v3 }
 0x174   :  { %v244_v5 = vpop.permute.xlu1 %243 }
 0x175   :  { %723 = vpow2.f32 %v401_v4  ;;  %v246_v6 = vsub.f32 %v887_v28, %v244_v5  ;;  %v365_v28 = vld [vmem:[#allocation3 + $0x8] sm:$0xff] }
 0x177   :  { %v247_v7 = vmul.f32 1.442695, %v246_v6 }
 0x179   :  { %725 = vpow2.f32 %v247_v7  ;;  %v345_v8 = vpop.permute.xlu2 %344 }
 0x17a   :  { %v347_v9 = vsub.f32 %v885_v27, %v345_v8 }
 0x17b   :  { %v724_v10 = vpop.eup %723 }
 0x17c   :  { %v348_v11 = vmul.f32 1.442695, %v347_v9  ;;  %v403_v12 = vpack.c.bf16 %v724_v10, %v724_v10 }
 0x17e   :  { %727 = vpow2.f32 %v348_v11  ;;  %412 = vmatmul.bf16.vlgmr.msra.gmra.mxu2 %v403_v12 }
 0x17f   :  { %v726_v13 = vpop.eup %725  ;;  %v315_v22 = vpop.permute.xlu1 %314 }
 0x180   :  { %v249_v14 = vpack.c.bf16 %v726_v13, %v726_v13  ;;  %v317_v26 = vmul.f32 %v315_v22, %v311_v23 }
 0x181   :  { %v369_v29 = vpop.permute.xlu2 %368 }
 0x182   :  { %306 = vmatmul.bf16.vlgmr.msra.gmra.mxu0 %v249_v14 }
 0x184   :  { %v728_v15 = vpop.eup %727 }
 0x185   :  { %v350_v16 = vpack.c.bf16 %v728_v15, %v728_v15 }
 0x187   :  { %359 = vmatmul.bf16.vlgmr.msra.gmra.mxu1 %v350_v16 }
 0x18a   :  { %v475_v41 = vpop.permute.xlu2 %474 }
 0x18b   :  { %v477_v42 = vmul.f32 %v475_v41, %v471_v40 }
 0x192   :  { %v451_v17 = vpop.permute.xlu0 %450 }
 0x193   :  { %v453_v18 = vsub.f32 %v894_v33, %v451_v17  ;;  %v422_v25 = vpop.permute.xlu1 %421  ;;  %v371_v33 = vmul.f32 %v369_v29, %v365_v28 }
 0x194   :  { %v424_v30 = vmul.f32 %v422_v25, %v418_v24 }
 0x195   :  { %v454_v19 = vmul.f32 1.442695, %v453_v18 }
 0x197   :  { %729 = vpow2.f32 %v454_v19 }
 0x19d   :  { %v730_v20 = vpop.eup %729 }
 0x19e   :  { %v456_v21 = vpack.c.bf16 %v730_v20, %v730_v20 }
 0x1a0   :  { %465 = vmatmul.bf16.vlgmr.msra.gmra.mxu3 %v456_v21 }
 0x1ff   :  { %v307_v27 = vpop.f32.mrf.mxu0 }
 0x200   :  { %v318_v31 = vadd.f32 %v317_v26, %v307_v27 }
 0x201   :  { %v413_v32 = vpop.f32.mrf.mxu2 }
 0x202   :  { %320 = vst.msk [vmem:[#allocation3] sm:$0xff] %vm189_vm1, %v318_v31  ;;  %v425_v34 = vadd.f32 %v424_v30, %v413_v32 }
 0x204   :  { %426 = vst.msk [vmem:[#allocation3 + $0x10] sm:$0xff] %vm189_vm1, %v425_v34  ;;  %v360_v35 = vpop.f32.mrf.mxu1 }
 0x205   :  { %v372_v36 = vadd.f32 %v371_v33, %v360_v35 }
 0x207   :  { %373 = vst.msk [vmem:[#allocation3 + $0x8] sm:$0xff] %vm189_vm1, %v372_v36  ;;  %v309_v37 = vpop.f32.mrf.mxu0 }
 0x209   :  { %v415_v38 = vpop.f32.mrf.mxu2 }
 0x20c   :  { %v362_v39 = vpop.f32.mrf.mxu1 }
 0x223   :  { %v466_v43 = vpop.f32.mrf.mxu3 }
 0x224   :  { %v478_v44 = vadd.f32 %v477_v42, %v466_v43 }
 0x226   :  { %479 = vst.msk [vmem:[#allocation3 + $0x18] sm:$0xff] %vm189_vm1, %v478_v44 }
 0x22b   :  { %v468_v45 = vpop.f32.mrf.mxu3 }
 0x22c PF:  { %v509_v47 = vld [vmem:[#allocation3 + $0x8] sm:$0xff]  ;;  %v786_v48 = vmov 32   ;;  %v500_v51 = vld [vmem:[#allocation2] sm:$0xff]  ;;  %v530_v52 = vld [vmem:[#allocation3 + $0x10] sm:$0xff]  ;;  %v787_v53 = vmov 2   ;;  %v788_v54 = vmov 0  }
 0x22d   :  { %v551_v46 = vld [vmem:[#allocation3 + $0x18] sm:$0xff]  ;;  %732 = vset.pattern.permute.xlu1 %v786_v48  ;;  %731 = vset.pattern.permute.xlu0 %v786_v48  ;;  %v510_v50 = vmax.f32 %v509_v47, 1e-30  ;;  %vm501_vm7 = vcmp.eq.f32.partialorder %v500_v51, -1e+30  ;;  %v485_v59 = vld [vmem:[#allocation3] sm:$0xff] }
 0x22e   :  { %v552_v49 = vmax.f32 %v551_v46, 1e-30  ;;  %734 = vset.pattern.permute.xlu2 %v787_v53  ;;  %v502_v55 = vsel %vm501_vm7, 1, %v788_v54  ;;  %v531_v56 = vmax.f32 %v530_v52, 1e-30  ;;  %v789_v60 = vmov 3  }
 0x22f   :  { %546 = vperm.xlu2 %734, %v502_v55   ;;  %v486_v61 = vmax.f32 %v485_v59, 1e-30  ;;  %v790_v63 = vmov 1   ;;  %s791_s3 = smov 96   ;;  %s792_s6 = smov 32   ;;  %vm583_vm0 = vcmask 261120  }
 0x230   :  { %738 = vrcp.f32 %v552_v49  ;;  %s793_s22 = smov 64   ;;  %vm585_vm1 = vcmask 523264   ;;  %s794_s23 = smov [#allocation7]   ;;  %vm587_vm2 = vcmask 785408  }
 0x231   :  { %740 = vrcp.f32 %v510_v50  ;;  %s595_s24 = sshll.u32 %s794_s23, 4  ;;  %s597_s27 = sshll.u32 %s926_s7, 4  ;;  %s596_s24 = int_to_ptr.vmem [resolvable:$true] %s595_s24  ;;  %s598_s27 = int_to_ptr.hbm [resolvable:$true] %s597_s27 }
 0x232   :  { %742 = vrcp.f32 %v531_v56 }
 0x233   :  { %744 = vrcp.f32 %v486_v61 }
 0x236   :  { %v739_v57 = vpop.eup %738 }
 0x237   :  { %v741_v58 = vpop.eup %740  ;;  %556 = vperm.xlu1 %732, %v739_v57   ;;  %735 = vset.pattern.permute.xlu2 %v789_v60 }
 0x238   :  { %514 = vperm.xlu0 %731, %v741_v58   ;;  %567 = vperm.xlu2 %735, %v502_v55   ;;  %v743_v62 = vpop.eup %742 }
 0x239   :  { %v745_v0 = vpop.eup %744 }
 0x23f   :  { %733 = vset.pattern.permute.xlu1 %v790_v63 }
 0x240   :  { %535 = vperm.xlu0 %731, %v743_v62   ;;  %525 = vperm.xlu1 %733, %v502_v55  }
 0x248   :  { %490 = vperm.xlu0 %731, %v745_v0   ;;  %736 = vset.pattern.permute.xlu1 %v788_v54 }
 0x249   :  { %504 = vperm.xlu1 %736, %v502_v55  }
 0x250   :  { %737 = vset.pattern.permute.xlu0 %v789_v60 }
 0x289   :  { %v547_v4 = vpop.permute.xlu2 %546 }
 0x28a   :  { %vm548_vm13 = vcmp.eq.s32.totalorder %v547_v4, 1 }
 0x292   :  { %v568_v12 = vpop.permute.xlu2 %567 }
 0x293   :  { %vm569_vm8 = vcmp.eq.s32.totalorder %v568_v12, 1 }
 0x2a9   :  { %v557_v1 = vpop.permute.xlu1 %556 }
 0x2aa   :  { %v559_v2 = vmul.f32 %v557_v1, %v551_v46  ;;  %v515_v3 = vpop.permute.xlu0 %514 }
 0x2ab   :  { %v517_v5 = vmul.f32 %v515_v3, %v509_v47 }
 0x2ac   :  { %v561_v6 = vmin.f32 %v559_v2, 0.0  ;;  %vm560_vm9 = vcmp.gt.f32.partialorder %v559_v2, 0.0 }
 0x2ad   :  { %v519_v7 = vmin.f32 %v517_v5, 0.0  ;;  %vm518_vm11 = vcmp.gt.f32.partialorder %v517_v5, 0.0 }
 0x2ae   :  { %v562_v8 = vmul.f32 1.442695, %v561_v6 }
 0x2af   :  { %v520_v9 = vmul.f32 1.442695, %v519_v7 }
 0x2b0   :  { %746 = vpow2.f32 %v562_v8 }
 0x2b1   :  { %748 = vpow2.f32 %v520_v9 }
 0x2b2   :  { %v536_v10 = vpop.permute.xlu0 %535  ;;  %v526_v14 = vpop.permute.xlu1 %525 }
 0x2b3   :  { %v538_v11 = vmul.f32 %v536_v10, %v530_v52  ;;  %vm527_vm10 = vcmp.eq.s32.totalorder %v526_v14, 1 }
 0x2b5   :  { %v540_v13 = vmin.f32 %v538_v11, 0.0  ;;  %vm539_vm12 = vcmp.gt.f32.partialorder %v538_v11, 0.0 }
 0x2b6   :  { %v747_v15 = vpop.eup %746 }
 0x2b7   :  { %v749_v16 = vpop.eup %748  ;;  %v541_v17 = vmul.f32 1.442695, %v540_v13  ;;  %v667_v18 = vadd.f32 -1.0, %v747_v15 }
 0x2b8   :  { %v665_v19 = vadd.f32 -1.0, %v749_v16 }
 0x2b9   :  { %750 = vpow2.f32 %v541_v17  ;;  %v565_v20 = vsel %vm560_vm9, %v559_v2, %v667_v18 }
 0x2ba   :  { %v570_v21 = vsel %vm569_vm8, 0.0, %v565_v20  ;;  %v523_v22 = vsel %vm518_vm11, %v517_v5, %v665_v19  ;;  %v491_v28 = vpop.permute.xlu0 %490 }
 0x2bb   :  { %v528_v23 = vsel %vm527_vm10, 0.0, %v523_v22  ;;  %580 = vrot.lane.b32.xlu1 %v570_v21, %s791_s3  ;;  %v493_v29 = vmul.f32 %v491_v28, %v485_v59  ;;  %v505_v33 = vpop.permute.xlu1 %504 }
 0x2bc   :  { %572 = vrot.lane.b32.xlu2 %v528_v23, %s792_s6  ;;  %vm506_vm15 = vcmp.eq.s32.totalorder %v505_v33, 1 }
 0x2bd   :  { %v495_v30 = vmin.f32 %v493_v29, 0.0  ;;  %vm494_vm14 = vcmp.gt.f32.partialorder %v493_v29, 0.0 }
 0x2bf   :  { %v751_v24 = vpop.eup %750  ;;  %v496_v31 = vmul.f32 1.442695, %v495_v30 }
 0x2c0   :  { %v666_v25 = vadd.f32 -1.0, %v751_v24 }
 0x2c1   :  { %752 = vpow2.f32 %v496_v31 }
 0x2c2   :  { %v544_v26 = vsel %vm539_vm12, %v538_v11, %v666_v25 }
 0x2c3   :  { %v549_v27 = vsel %vm548_vm13, 0.0, %v544_v26 }
 0x2c4   :  { %576 = vrot.lane.b32.xlu0 %v549_v27, %s793_s22 }
 0x2c7   :  { %v753_v32 = vpop.eup %752 }
 0x2c8   :  { %v664_v34 = vadd.f32 -1.0, %v753_v32 }
 0x2ca   :  { %v499_v35 = vsel %vm494_vm14, %v493_v29, %v664_v34 }
 0x2cb   :  { %v507_v37 = vsel %vm506_vm15, 0.0, %v499_v35 }
 0x316   :  { %v573_v36 = vpop.permute.xlu2 %572 }
 0x317   :  { %v584_v38 = vsel %vm583_vm0, %v507_v37, %v573_v36 }
 0x32d   :  { %v581_v40 = vpop.permute.xlu1 %580 }
 0x336   :  { %v577_v39 = vpop.permute.xlu0 %576 }
 0x337   :  { %v586_v41 = vsel %vm585_vm1, %v584_v38, %v577_v39 }
 0x338   :  { %v588_v42 = vsel %vm587_vm2, %v586_v41, %v581_v40 }
 0x339   :  { %589 = vst [vmem:[#allocation7] sm:$0xff] %v588_v42 }
 0x33a   :  { %600 = dma.vmem_to_hbm [thread:$0]  %s596_s24, 128, %s598_s27, [#allocation8]  }
 0x33b   :  { %778 = dma.done.wait [#allocation8], 128  }
 0x33c   :  { %779 = vsyncadd [#allocation8], 4294967168 }
 0x33d   :  { %605 = vsyncpa [#allocation8], 1 }

</bundles_post_ra>
